<compile_context>
chip_gen: v7x
topology: tpu7x:2x2x1
jax: 0.10.0
libtpu: 0.0.40
codegen_flags: <defaults>
</compile_context>

<pallas_src>
import jax
import jax.numpy as jnp
from jax.experimental import pallas as pl
from jax.experimental.pallas import tpu as pltpu


def _ffn_kernel(x_ref, w1_ref, b1_ref, w2_ref, b2_ref, o_ref, acc_ref):
    # x_ref:  (tile_m, dim)        token tile (native dtype)
    # w1_ref: (dim, tile_h)        W1 hidden-chunk
    # b1_ref: (1, tile_h)
    # w2_ref: (tile_h, dim)        W2 hidden-chunk
    # b2_ref: (1, dim)
    # o_ref:  (tile_m, dim)        output tile (written on last hidden step)
    # acc_ref:(tile_m, dim) f32    VMEM accumulator across the hidden axis
    h_idx = pl.program_id(1)

    @pl.when(h_idx == 0)
    def _():
        acc_ref[...] = jnp.zeros_like(acc_ref)

    # First linear (MXU, native-dtype inputs, f32 accumulation).
    h = jnp.dot(x_ref[...], w1_ref[...], preferred_element_type=jnp.float32)
    h = h + b1_ref[...].astype(jnp.float32)

    # Exact GELU (matches torch.nn.GELU default, erf-based), on the f32 chunk.
    h = 0.5 * h * (1.0 + jax.lax.erf(h * 0.7071067811865476))

    # Second linear: partial contribution of this hidden chunk, accumulated in f32.
    acc_ref[...] += jnp.dot(h.astype(w2_ref.dtype), w2_ref[...],
                            preferred_element_type=jnp.float32)

    @pl.when(h_idx == pl.num_programs(1) - 1)
    def _():
        o_ref[...] = (acc_ref[...] + b2_ref[...].astype(jnp.float32)
                      ).astype(o_ref.dtype)


def feedforward(x, w1, b1, w2, b2, *, tile_m=256, tile_h=512):
    """x: (batch, seq, dim); w1: (dim, hidden); b1: (hidden,);
    w2: (hidden, dim); b2: (dim,). Returns (batch, seq, dim)."""
    batch, seq, dim = x.shape
    d_in, hidden = w1.shape
    assert d_in == dim and w2.shape == (hidden, dim)
    assert b1.shape == (hidden,) and b2.shape == (dim,)

    m = batch * seq
    x2 = x.reshape(m, dim)

    # ---- tile selection ---------------------------------------------------
    # Token tile: cap at m; keep it a multiple of 8 sublanes when it tiles m.
    tile_m = min(tile_m, m)
    if tile_m < m and tile_m % 8 != 0:
        tile_m = max(8, (tile_m // 8) * 8)
    # Hidden tile: must evenly divide hidden and be lane-aligned (mult. of 128)
    # unless it covers the whole hidden dim.
    tile_h = min(tile_h, hidden)
    if tile_h < hidden and (tile_h % 128 != 0 or hidden % tile_h != 0):
        tile_h = hidden

    # Pad tokens so the grid divides evenly; padded rows are sliced off below.
    m_pad = ((m + tile_m - 1) // tile_m) * tile_m
    if m_pad != m:
        x2 = jnp.pad(x2, ((0, m_pad - m), (0, 0)))

    grid_m = m_pad // tile_m
    grid_h = hidden // tile_h

    b1_2d = b1.reshape(1, hidden)
    b2_2d = b2.reshape(1, dim)

    # ---- VMEM budget (double-buffered tiles + f32 accumulator + headroom) --
    xsz = x2.dtype.itemsize
    wsz = w1.dtype.itemsize
    osz = x.dtype.itemsize
    vmem_bytes = (
        2 * tile_m * dim * xsz          # x tile (double-buffered)
        + 2 * dim * tile_h * wsz        # W1 chunk
        + 2 * tile_h * dim * wsz        # W2 chunk
        + 2 * tile_h * wsz + 2 * dim * wsz  # biases
        + 2 * tile_m * dim * osz        # output tile
        + tile_m * dim * 4              # f32 accumulator scratch
        + 2 * tile_m * tile_h * 4       # live f32 activation chunk (+ GELU temps)
    )
    vmem_limit = min(64 << 20, max(32 << 20, int(1.25 * vmem_bytes)))

    cost = pl.CostEstimate(
        flops=4 * m * dim * hidden,          # two matmuls
        transcendentals=m * hidden,          # erf over the hidden activations
        bytes_accessed=(x2.size * xsz + w1.size * wsz + w2.size * wsz
                        + b1.size * wsz + b2.size * wsz + m_pad * dim * osz),
    )

    out = pl.pallas_call(
        _ffn_kernel,
        out_shape=jax.ShapeDtypeStruct((m_pad, dim), x.dtype),
        grid_spec=pltpu.PrefetchScalarGridSpec(
            num_scalar_prefetch=0,
            grid=(grid_m, grid_h),
            in_specs=[
                pl.BlockSpec((tile_m, dim), lambda i, h: (i, 0)),   # x tile
                pl.BlockSpec((dim, tile_h), lambda i, h: (0, h)),   # W1 chunk
                pl.BlockSpec((1, tile_h), lambda i, h: (0, h)),     # b1 chunk
                pl.BlockSpec((tile_h, dim), lambda i, h: (h, 0)),   # W2 chunk
                pl.BlockSpec((1, dim), lambda i, h: (0, 0)),        # b2
            ],
            out_specs=pl.BlockSpec((tile_m, dim), lambda i, h: (i, 0)),
            scratch_shapes=[pltpu.VMEM((tile_m, dim), jnp.float32)],
        ),
        compiler_params=pltpu.CompilerParams(
            dimension_semantics=("parallel", "arbitrary"),
            vmem_limit_bytes=vmem_limit,
        ),
        cost_estimate=cost,
    )(x2, w1, b1_2d, w2, b2_2d)

    if m_pad != m:
        out = out[:m]
    return out.reshape(batch, seq, dim)


def feedforward_ref(x, w1, b1, w2, b2):
    """Pure-JAX reference (same math as the PyTorch module, eval mode)."""
    h = jnp.einsum("bsd,dh->bsh", x.astype(jnp.float32), w1.astype(jnp.float32)) + b1
    h = 0.5 * h * (1.0 + jax.lax.erf(h * 0.7071067811865476))
    y = jnp.einsum("bsh,hd->bsd", h, w2.astype(jnp.float32)) + b2
    return y.astype(x.dtype)


def _make_params(key, dim, hidden, dtype):
    k1, k2, k3, k4 = jax.random.split(key, 4)
    lim1 = 1.0 / jnp.sqrt(dim)
    lim2 = 1.0 / jnp.sqrt(hidden)
    w1 = jax.random.uniform(k1, (dim, hidden), jnp.float32, -lim1, lim1).astype(dtype)
    b1 = jax.random.uniform(k2, (hidden,), jnp.float32, -lim1, lim1).astype(dtype)
    w2 = jax.random.uniform(k3, (hidden, dim), jnp.float32, -lim2, lim2).astype(dtype)
    b2 = jax.random.uniform(k4, (dim,), jnp.float32, -lim2, lim2).astype(dtype)
    return w1, b1, w2, b2


if __name__ == "__main__":
    # --- Small demo shapes consistent with the module: batch=2, seq=8, dim=32, hidden=64.
    batch, seq, dim, hidden = 2, 8, 32, 64
    key = jax.random.PRNGKey(0)
    kx, kp = jax.random.split(key, 2)
    x = jax.random.normal(kx, (batch, seq, dim), dtype=jnp.float32)
    w1, b1, w2, b2 = _make_params(kp, dim, hidden, jnp.float32)

    y = jax.block_until_ready(feedforward(x, w1, b1, w2, b2))
    y_ref = feedforward_ref(x, w1, b1, w2, b2)
    assert y.shape == (batch, seq, dim)
    assert jnp.allclose(y, y_ref, atol=1e-5, rtol=1e-5)

    # --- bf16 params/activations: exercises the native-dtype MXU path.
    xb = x.astype(jnp.bfloat16)
    w1b, b1b, w2b, b2b = (t.astype(jnp.bfloat16) for t in (w1, b1, w2, b2))
    yb = jax.block_until_ready(feedforward(xb, w1b, b1b, w2b, b2b))
    yb_ref = feedforward_ref(xb, w1b, b1b, w2b, b2b)
    assert jnp.allclose(yb.astype(jnp.float32), yb_ref.astype(jnp.float32),
                        atol=3e-2, rtol=3e-2)

    # --- Larger shapes: exercises token tiling + padding (grid_m > 1) and
    #     hidden tiling with the f32 accumulator (grid_h > 1).
    batch2, seq2, dim2, hid2 = 2, 136, 128, 1024
    key2 = jax.random.PRNGKey(1)
    kx2, kp2 = jax.random.split(key2, 2)
    x_l = jax.random.normal(kx2, (batch2, seq2, dim2), dtype=jnp.float32)
    w1_l, b1_l, w2_l, b2_l = _make_params(kp2, dim2, hid2, jnp.float32)
    y_l = jax.block_until_ready(feedforward(x_l, w1_l, b1_l, w2_l, b2_l))
    y_l_ref = feedforward_ref(x_l, w1_l, b1_l, w2_l, b2_l)
    assert jnp.allclose(y_l, y_l_ref, atol=2e-4, rtol=2e-4)

    print("KERNEL_OK")
</pallas_src>

<mosaic_0001>
module attributes {stable_mosaic.version = 11 : i64} {
  func.func @_ffn_kernel(%arg0: i32, %arg1: i32, %arg2: memref<16x32xf32, #tpu.memory_space<vmem>>, %arg3: memref<32x64xf32, #tpu.memory_space<vmem>>, %arg4: memref<1x64xf32, #tpu.memory_space<vmem>>, %arg5: memref<64x32xf32, #tpu.memory_space<vmem>>, %arg6: memref<1x32xf32, #tpu.memory_space<vmem>>, %arg7: memref<16x32xf32, #tpu.memory_space<vmem>>, %arg8: memref<16x32xf32, #tpu.memory_space<vmem>>) attributes {dimension_semantics = [#tpu.dimension_semantics<parallel>, #tpu.dimension_semantics<arbitrary>], iteration_bounds = array<i64: 1, 1>, scalar_prefetch = 0 : i64, scratch_operands = 1 : i64, tpu.core_type = #tpu.core_type<tc>, window_params = [{transform_indices = @transform_0, window_bounds = array<i64: 16, 32>}, {transform_indices = @transform_1, window_bounds = array<i64: 32, 64>}, {transform_indices = @transform_2, window_bounds = array<i64: 1, 64>}, {transform_indices = @transform_3, window_bounds = array<i64: 64, 32>}, {pipeline_mode = #tpu.pipeline_mode<synchronous>, transform_indices = @transform_4, window_bounds = array<i64: 1, 32>}, {transform_indices = @transform_5, window_bounds = array<i64: 16, 32>}]} {
    %c0_i32 = arith.constant 0 : i32
    %0 = arith.cmpi eq, %arg1, %c0_i32 : i32
    %1 = arith.extui %0 : i1 to i32
    %c0_i32_0 = arith.constant 0 : i32
    %2 = arith.cmpi ne, %1, %c0_i32_0 : i32
    scf.if %2 {
      %cst_18 = arith.constant 0.000000e+00 : f32
      %25 = vector.broadcast %cst_18 : f32 to vector<16x32xf32>
      %c0_19 = arith.constant 0 : index
      %c0_20 = arith.constant 0 : index
      %26 = vector.load %arg8[%c0_19, %c0_20] : memref<16x32xf32, #tpu.memory_space<vmem>>, vector<16x32xf32>
      tpu.vector_store %arg8[%c0_19, %c0_20], %25 {strides = array<i32>} : memref<16x32xf32, #tpu.memory_space<vmem>>, vector<16x32xf32>,
    } else {
    }
    %c0 = arith.constant 0 : index
    %c0_1 = arith.constant 0 : index
    %3 = vector.load %arg2[%c0, %c0_1] : memref<16x32xf32, #tpu.memory_space<vmem>>, vector<16x32xf32>
    %c0_2 = arith.constant 0 : index
    %c0_3 = arith.constant 0 : index
    %4 = vector.load %arg3[%c0_2, %c0_3] : memref<32x64xf32, #tpu.memory_space<vmem>>, vector<32x64xf32>
    %cst = arith.constant dense<0.000000e+00> : vector<16x64xf32>
    %5 = tpu.matmul %3, %4, %cst {dimension_numbers = #tpu.dot_dimension_numbers<[1], [0], [0], [1], [0, 0, 1, 1], [], []>} : vector<16x32xf32>, vector<32x64xf32>, vector<16x64xf32> -> vector<16x64xf32>
    %c0_4 = arith.constant 0 : index
    %c0_5 = arith.constant 0 : index
    %6 = vector.load %arg4[%c0_4, %c0_5] : memref<1x64xf32, #tpu.memory_space<vmem>>, vector<1x64xf32>
    %7 = vector.broadcast %6 : vector<1x64xf32> to vector<16x64xf32>
    %8 = arith.addf %5, %7 : vector<16x64xf32>
    %cst_6 = arith.constant 5.000000e-01 : f32
    %9 = vector.broadcast %cst_6 : f32 to vector<16x64xf32>
    %10 = arith.mulf %9, %8 : vector<16x64xf32>
    %cst_7 = arith.constant 0.707106769 : f32
    %11 = vector.broadcast %cst_7 : f32 to vector<16x64xf32>
    %12 = arith.mulf %8, %11 : vector<16x64xf32>
    %13 = math.erf %12 : vector<16x64xf32>
    %cst_8 = arith.constant 1.000000e+00 : f32
    %14 = vector.broadcast %cst_8 : f32 to vector<16x64xf32>
    %15 = arith.addf %14, %13 : vector<16x64xf32>
    %16 = arith.mulf %10, %15 : vector<16x64xf32>
    %c0_9 = arith.constant 0 : index
    %c0_10 = arith.constant 0 : index
    %17 = vector.load %arg8[%c0_9, %c0_10] : memref<16x32xf32, #tpu.memory_space<vmem>>, vector<16x32xf32>
    %c0_11 = arith.constant 0 : index
    %c0_12 = arith.constant 0 : index
    %18 = vector.load %arg5[%c0_11, %c0_12] : memref<64x32xf32, #tpu.memory_space<vmem>>, vector<64x32xf32>
    %cst_13 = arith.constant dense<0.000000e+00> : vector<16x32xf32>
    %19 = tpu.matmul %16, %18, %cst_13 {dimension_numbers = #tpu.dot_dimension_numbers<[1], [0], [0], [1], [0, 0, 1, 1], [], []>} : vector<16x64xf32>, vector<64x32xf32>, vector<16x32xf32> -> vector<16x32xf32>
    %20 = arith.addf %17, %19 : vector<16x32xf32>
    %c0_14 = arith.constant 0 : index
    %c0_15 = arith.constant 0 : index
    %21 = vector.load %arg8[%c0_14, %c0_15] : memref<16x32xf32, #tpu.memory_space<vmem>>, vector<16x32xf32>
    tpu.vector_store %arg8[%c0_14, %c0_15], %20 {strides = array<i32>} : memref<16x32xf32, #tpu.memory_space<vmem>>, vector<16x32xf32>,
    %c0_i32_16 = arith.constant 0 : i32
    %22 = arith.cmpi eq, %arg1, %c0_i32_16 : i32
    %23 = arith.extui %22 : i1 to i32
    %c0_i32_17 = arith.constant 0 : i32
    %24 = arith.cmpi ne, %23, %c0_i32_17 : i32
    scf.if %24 {
      %c0_18 = arith.constant 0 : index
      %c0_19 = arith.constant 0 : index
      %25 = vector.load %arg8[%c0_18, %c0_19] : memref<16x32xf32, #tpu.memory_space<vmem>>, vector<16x32xf32>
      %c0_20 = arith.constant 0 : index
      %c0_21 = arith.constant 0 : index
      %26 = vector.load %arg6[%c0_20, %c0_21] : memref<1x32xf32, #tpu.memory_space<vmem>>, vector<1x32xf32>
      %27 = vector.broadcast %26 : vector<1x32xf32> to vector<16x32xf32>
      %28 = arith.addf %25, %27 : vector<16x32xf32>
      %c0_22 = arith.constant 0 : index
      %c0_23 = arith.constant 0 : index
      %29 = vector.load %arg7[%c0_22, %c0_23] : memref<16x32xf32, #tpu.memory_space<vmem>>, vector<16x32xf32>
      tpu.vector_store %arg7[%c0_22, %c0_23], %28 {strides = array<i32>} : memref<16x32xf32, #tpu.memory_space<vmem>>, vector<16x32xf32>,
    } else {
    }
    return
  }
  func.func @transform_0(%arg0: i32, %arg1: i32) -> (i32, i32) {
    %c0_i32 = arith.constant 0 : i32
    %c0_i32_0 = arith.constant 0 : i32
    return %arg0, %c0_i32 : i32, i32
  }
  func.func @transform_1(%arg0: i32, %arg1: i32) -> (i32, i32) {
    %c0_i32 = arith.constant 0 : i32
    %c0_i32_0 = arith.constant 0 : i32
    return %c0_i32, %arg1 : i32, i32
  }
  func.func @transform_2(%arg0: i32, %arg1: i32) -> (i32, i32) {
    %c0_i32 = arith.constant 0 : i32
    %c0_i32_0 = arith.constant 0 : i32
    return %c0_i32, %arg1 : i32, i32
  }
  func.func @transform_3(%arg0: i32, %arg1: i32) -> (i32, i32) {
    %c0_i32 = arith.constant 0 : i32
    %c0_i32_0 = arith.constant 0 : i32
    return %arg1, %c0_i32 : i32, i32
  }
  func.func @transform_4(%arg0: i32, %arg1: i32) -> (i32, i32) {
    %c0_i32 = arith.constant 0 : i32
    %c0_i32_0 = arith.constant 0 : i32
    %c0_i32_1 = arith.constant 0 : i32
    return %c0_i32, %c0_i32_0 : i32, i32
  }
  func.func @transform_5(%arg0: i32, %arg1: i32) -> (i32, i32) {
    %c0_i32 = arith.constant 0 : i32
    %c0_i32_0 = arith.constant 0 : i32
    return %arg0, %c0_i32 : i32, i32
  }
}

</mosaic_0001>

<bundles_post_ra>
// kernel: tpu_custom_call.1
= control target key start
LH: loop header
LB: loop body
LE: loop exit
PB: predicated region body
PF: predicated region fallthrough
CT: control target
= control target key end

     0   :  { %vm25_vm0 = vcmask 261120   ;;  %s471_s0 = inlined_call_operand.vmem [shape: f32[16,32], index: 0, kind: input, shape index: {}]   ;;  %s472_s1 = inlined_call_operand.vmem [shape: f32[32,64], index: 1, kind: input, shape index: {}]   ;;  %s473_s2 = inlined_call_operand.vmem [shape: f32[1,64], index: 2, kind: input, shape index: {}]   ;;  %s474_s3 = inlined_call_operand.vmem [shape: f32[64,32], index: 3, kind: input, shape index: {}]   ;;  %s475_s4 = inlined_call_operand.vmem [shape: f32[1,32], index: 4, kind: input, shape index: {}]   ;;  %s476_s5 = inlined_call_operand.hbm [shape: f32[16,32], index: 5, kind: output, shape index: {}]  }
   0x1   :  { %v30_v0 = vld [vmem:[%s472_s1] sm:$0xff]  ;;  %v31_v1 = vld [vmem:[%s472_s1 + $0x8] sm:$0xff]  ;;  %v32_v2 = vld [vmem:[%s472_s1 + $0x10] sm:$0xff] }
   0x2   :  { %v313_v3 = vpack.c.bf16 %v31_v1, %v30_v0  ;;  %v33_v4 = vld [vmem:[%s472_s1 + $0x18] sm:$0xff]  ;;  %v28_v5 = vld [vmem:[%s471_s0] sm:$0xff] }
   0x3   :  { %v317_v6 = vpack.c.bf16 %v33_v4, %v32_v2  ;;  %291 = vmatprep.mubr.msk.f32.mxu0 %vm25_vm0, %v28_v5 }
   0x4   :  { %10 = vsyncpa [#allocation4], 0  ;;  %314 = vmatprep.subr.bf16.mxu0 %v313_v3  ;;  %v29_v7 = vld [vmem:[%s471_s0 + $0x8] sm:$0xff]  ;;  %v135_v8 = vld [vmem:[%s474_s3] sm:$0xff]  ;;  %v369_v20 = vmov 0.0   ;;  %vm143_vm1 = vcmask 523264  }
   0x5   :  { %316 = vmatpush3.bf16.msra.mxu0 %v313_v3  ;;  %v136_v9 = vld [vmem:[%s474_s3 + $0x8] sm:$0xff]  ;;  %v137_v11 = vld [vmem:[%s474_s3 + $0x10] sm:$0xff]  ;;  %v138_v12 = vld [vmem:[%s474_s3 + $0x18] sm:$0xff]  ;;  %27 = vst.msk [vmem:[#allocation2 + $0x8] sm:$0xff] %vm25_vm0, %v369_v20  ;;  %s370_s21 = smov [#allocation3]  }
   0x6   :  { %318 = vmatprep.subr.bf16.mxu0 %v317_v6  ;;  %v321_v10 = vpack.c.bf16 %v136_v9, %v135_v8  ;;  %v325_v13 = vpack.c.bf16 %v138_v12, %v137_v11  ;;  %v139_v14 = vld [vmem:[%s474_s3 + $0x20] sm:$0xff]  ;;  %v140_v15 = vld [vmem:[%s474_s3 + $0x28] sm:$0xff]  ;;  %v141_v17 = vld [vmem:[%s474_s3 + $0x30] sm:$0xff]  ;;  %26 = vst.msk [vmem:[#allocation2] sm:$0xff] %vm25_vm0, %v369_v20  ;;  %s250_s22 = sshll.u32 %s370_s21, 4  ;;  %s251_s22 = int_to_ptr.vmem [resolvable:$true] %s250_s22 }
   0x7   :  { %v329_v16 = vpack.c.bf16 %v140_v15, %v139_v14  ;;  %v142_v18 = vld [vmem:[%s474_s3 + $0x38] sm:$0xff]  ;;  %v261_v21 = vld [vmem:[%s473_s2] ss:$0 sm:$0xff]  ;;  %s345_s23 = scalar_lea.vmem %s251_s22, 256  ;;  %p350_p1 = scmp.lt.s32.totalorder %s251_s22, %s251_s22 }
   0x8   :  { %322 = vmatprep.subr.bf16.mxu1 %v321_v10  ;;  %v333_v19 = vpack.c.bf16 %v142_v18, %v141_v17  ;;  %v266_v42 = vld [vmem:[%s475_s4] ss:$0 sm:$0xff]  ;;  %p346_p0 = scmp.ne.s32.totalorder %s251_s22, %s345_s23  ;;  %p351_p2 = scmp.lt.s32.totalorder %s345_s23, %s345_s23 }
   0x9   :  { %320 = vmatpush3.bf16.msra.mxu0 %v317_v6  ;;  %324 = vmatpush3.bf16.msra.mxu1 %v321_v10 }
   0xa   :  { %326 = vmatprep.subr.bf16.mxu1 %v325_v13  ;;  %p352_p3 = por %p351_p2, %p350_p1 }
   0xc   :  { %292 = vmatmul.mubr.msk.f32.vlgmr.msra.gmra.mrb[0].mxu0 %vm25_vm0, %v29_v7  ;;  %v134_v36 = vld [vmem:[#allocation2 + $0x8] sm:$0xff]  ;;  %p353_p4 = pnand %p352_p3, %p346_p0 }
   0xd   :  { %328 = vmatpush3.bf16.msra.mxu1 %v325_v13  ;;  %v133_v37 = vld [vmem:[#allocation2] sm:$0xff] }
   0xe   :  { %330 = vmatprep.subr.bf16.mxu1 %v329_v16 }
  0x11   :  { %332 = vmatpush3.bf16.msra.mxu1 %v329_v16 }
  0x12   :  { %334 = vmatprep.subr.bf16.mxu1 %v333_v19 }
  0x15   :  { %336 = vmatpush3.bf16.msra.mxu1 %v333_v19 }
  0xdf   :  { %v293_v22 = vpop.f32.mrb[0].mxu0 }
  0xe0   :  { %v120_v23 = vadd.f32 %v293_v22, %v261_v21  ;;  %v114_v24 = vpop.f32.mrb[1].mxu0 }
  0xe1   :  { %v115_v25 = vadd.f32 %v261_v21, %v114_v24 }
  0xe2   :  { %v126_v26 = vmul.f32 0.70710677, %v120_v23  ;;  %v124_v33 = vmul.f32 0.5, %v120_v23 }
  0xe3   :  { %v125_v27 = vmul.f32 0.70710677, %v115_v25  ;;  %v123_v31 = vmul.f32 0.5, %v115_v25 }
  0xe4   :  { %341 = verf.f32 %v126_v26 }
  0xe5   :  { %343 = verf.f32 %v125_v27 }
  0xee   :  { %v342_v28 = vpop.eup %341 }
  0xef   :  { %v344_v29 = vpop.eup %343  ;;  %v130_v30 = vadd.f32 1.0, %v342_v28 }
  0xf0   :  { %v129_v32 = vadd.f32 1.0, %v344_v29 }
  0xf1   :  { %v132_v35 = vmul.f32 %v130_v30, %v124_v33 }
  0xf2   :  { %v131_v34 = vmul.f32 %v129_v32, %v123_v31 }
  0xf4   :  { %310 = vmatprep.mubr.msk.f32.mxu1 %vm143_vm1, %v131_v34 }
  0xf5   :  { %311 = vmatmul.mubr.msk.f32.vlgmr.msra.gmra.mrb[0].mxu1 %vm143_vm1, %v132_v35 }
 0x1c8   :  { %v312_v38 = vpop.f32.mrb[0].mxu1 }
 0x1c9   :  { %v226_v39 = vadd.f32 %v312_v38, %v134_v36  ;;  %v216_v40 = vpop.f32.mrb[1].mxu1 }
 0x1ca   :  { %v225_v41 = vadd.f32 %v216_v40, %v133_v37 }
 0x1cb   :  { %228 = vst.msk [vmem:[#allocation2 + $0x8] sm:$0xff] %vm25_vm0, %v226_v39 }
 0x1cc   :  { %227 = vst.msk [vmem:[#allocation2] sm:$0xff] %vm25_vm0, %v225_v41 }
 0x1d2   :  { %v233_v43 = vld [vmem:[#allocation2 + $0x8] sm:$0xff] }
 0x1d3   :  { %v232_v44 = vld [vmem:[#allocation2] sm:$0xff]  ;;  %v242_v45 = vadd.f32 %v266_v42, %v233_v43 }
 0x1d4   :  { %v241_v46 = vadd.f32 %v266_v42, %v232_v44 }
 0x1d5   :  { %244 = vst.msk [vmem:[#allocation3 + $0x8] sm:$0xff] %vm25_vm0, %v242_v45 }
 0x1d6   :  { %243 = vst.msk [vmem:[#allocation3] sm:$0xff] %vm25_vm0, %v241_v46 }
 0x1d7   :  { %356 = shalt.err (!%p353_p4)
}
 0x1d8   :  { %s357_s25 = scalar_lea.hbm %s476_s5, 256 }
 0x1d9   :  { %p358_p5 = scmp.ne.s32.totalorder %s476_s5, %s357_s25  ;;  %p361_p6 = scmp.lt.u32.totalorder %s357_s25, %s476_s5 }
 0x1db   :  { %p363_p7 = pnand %p361_p6, %p358_p5 }
 0x1dd   :  { %366 = shalt.err (!%p363_p7)
}
 0x1de   :  { %s371_s30 = smov 128   ;;  %s372_s1 = smov 8  }
 0x1df   :  { %256 = dma.vmem_to_hbm [thread:$0]  %s251_s22, 256, %s476_s5, [#allocation4], %s371_s30, %s371_s30, %s372_s1  }
 0x1e0   :  { %367 = dma.done.wait [#allocation4], 256  }
 0x1e1   :  { %368 = vsyncadd [#allocation4], 4294967040 }
 0x1e2   :  { %260 = vsyncpa [#allocation4], 1 }

</bundles_post_ra>
